<compile_context>
chip_gen: v5e
topology: v5e:2x2
jax: 0.10.0
libtpu: 0.0.40
codegen_flags: <defaults>
</compile_context>

<pallas_src>
import functools

import jax
import jax.numpy as jnp
from jax.experimental import pallas as pl
from jax.experimental.pallas import tpu as pltpu


# ----------------------------------------------------------------------------
# In-kernel attention MLP (shared by the fused kernel and the pool epilogue)
# ----------------------------------------------------------------------------

def _attention_scale(pooled_col, w1t, b1, g, s, w2, b2):
    """pooled_col: (C, 1) f32  ->  (att + 1) scale, (C, 1) f32.

    Pure VPU broadcasts + lane/sublane reductions (no matmul, no transposes),
    so it lowers cleanly for any small C:
      h[j]   = relu( bn( sum_c w1t[c, j] * pooled[c] + b1[j] ) )   -> (1, 2C) row
      att[c] = sigmoid( sum_j w2[c, j] * h[j] + b2[c] )            -> (C, 1) col
    The residual add is folded:  att*x + x == x * (att + 1).
    """
    h = jnp.sum(w1t * pooled_col, axis=0, keepdims=True) + b1        # (1, 2C)
    h = jnp.maximum(h * g + s, 0.0)                                  # BN(eval)+ReLU
    att = jax.nn.sigmoid(jnp.sum(w2 * h, axis=1, keepdims=True) + b2)  # (C, 1)
    return att + 1.0


# ----------------------------------------------------------------------------
# Kernels
# ----------------------------------------------------------------------------

def _fused_kernel(x_ref, w1t_ref, b1_ref, g_ref, s_ref, w2_ref, b2_ref, o_ref):
    """Single pass per batch: pool -> MLP -> scale, x resident in VMEM.

    x_ref/o_ref block: (1, C, HW) -- HW on the lane axis (lane-dense stores).
    """
    x = x_ref[0]                                                     # (C, HW)
    pooled = jnp.max(x, axis=1, keepdims=True).astype(jnp.float32)   # (C, 1)
    scale = _attention_scale(pooled, w1t_ref[...], b1_ref[...], g_ref[...],
                             s_ref[...], w2_ref[...], b2_ref[...])
    o_ref[0] = x * scale.astype(x.dtype)


def _pool_mlp_kernel(x_ref, w1t_ref, b1_ref, g_ref, s_ref, w2_ref, b2_ref,
                     scale_ref, acc_ref, *, hw_total, hw_tile):
    """Streaming pass 1: global max over HW tiles + MLP epilogue.

    x_ref block: (1, C, hw_tile); scale_ref block: (1, C, 1) (resident over t);
    acc_ref: (C, 1) f32 VMEM scratch running maximum.
    """
    t = pl.program_id(1)
    x = x_ref[0]                                                     # (C, hw_tile)
    if hw_total % hw_tile != 0:
        # Mask the out-of-range lanes of the ragged last tile.
        lane = jax.lax.broadcasted_iota(jnp.int32, x.shape, 1) + t * hw_tile
        x = jnp.where(lane < hw_total, x, jnp.asarray(-jnp.inf, dtype=x.dtype))
    m = jnp.max(x, axis=1, keepdims=True).astype(jnp.float32)        # (C, 1)

    @pl.when(t == 0)
    def _init():
        acc_ref[...] = m

    @pl.when(t != 0)
    def _acc():
        acc_ref[...] = jnp.maximum(acc_ref[...], m)

    @pl.when(t == pl.num_programs(1) - 1)
    def _epilogue():
        scale = _attention_scale(acc_ref[...], w1t_ref[...], b1_ref[...],
                                 g_ref[...], s_ref[...], w2_ref[...], b2_ref[...])
        scale_ref[0] = scale.astype(scale_ref.dtype)


def _scale_kernel(x_ref, s_ref, o_ref):
    """Streaming pass 2: out = x * (att + 1), native dtype, lane-dense blocks."""
    o_ref[0] = x_ref[0] * s_ref[0]


# ----------------------------------------------------------------------------
# Wrapper
# ----------------------------------------------------------------------------

def _vmem_capacity_bytes():
    """Per-core VMEM capacity (128 MiB v5e/v6e, 64 MiB v7x); safe fallback."""
    try:
        return int(pltpu.get_tpu_info().vmem_capacity_bytes)
    except Exception:
        return 64 << 20


def _weight_specs(shapes, arity):
    """Whole-array weight blocks with constant index maps (stay resident)."""
    if arity == 1:
        idx = lambda n: (0, 0)
    else:
        idx = lambda n, t: (0, 0)
    return [pl.BlockSpec(shape, idx) for shape in shapes]


def chanel_att_pallas(x_nchw, params, *, donate_x=False, force_streaming=False,
                      hw_tile_override=None):
    """x_nchw: (N, C, H, W). Returns (N, C, H, W). Eval-mode chanelAtt."""
    N, C, H, W = x_nchw.shape
    HW = H * W
    dtype = x_nchw.dtype
    itemsize = jnp.dtype(dtype).itemsize
    C2 = 2 * C

    w1t, b1, bn_g, bn_s, w2, b2 = params      # (C,2C),(1,2C),(1,2C),(1,2C),(C,2C),(C,1)
    weights = (w1t, b1, bn_g, bn_s, w2, b2)
    w_shapes = tuple(w.shape for w in weights)
    weight_bytes = int(sum(w.size * jnp.dtype(w.dtype).itemsize for w in weights))

    # Free reshape: NCHW kept, HW sits on the lane (last) axis.
    x3 = x_nchw.reshape(N, C, HW)

    vmem_cap = _vmem_capacity_bytes()
    budget = (vmem_cap * 3) // 4              # leave ~25% headroom for the compiler
    slice_bytes = C * HW * itemsize
    alias = {0: 0} if donate_x else {}

    sigmoids = N * C
    mlp_flops = N * (4 * C * C2 + 6 * C2 + 3 * C)

    # ---- fused single-pass path: x read once, written once (2x traffic) ----
    use_fused = (not force_streaming) and \
        (4 * slice_bytes + 2 * weight_bytes + (2 << 20) <= budget)

    if use_fused:
        out3 = pl.pallas_call(
            _fused_kernel,
            out_shape=jax.ShapeDtypeStruct((N, C, HW), dtype),
            grid=(N,),
            in_specs=[pl.BlockSpec((1, C, HW), lambda n: (n, 0, 0))]
                     + _weight_specs(w_shapes, arity=1),
            out_specs=pl.BlockSpec((1, C, HW), lambda n: (n, 0, 0)),
            input_output_aliases=alias,
            compiler_params=pltpu.CompilerParams(
                dimension_semantics=("parallel",),
                vmem_limit_bytes=int(budget)),
            cost_estimate=pl.CostEstimate(
                flops=2 * N * C * HW + mlp_flops,
                transcendentals=sigmoids,
                bytes_accessed=2 * N * C * HW * itemsize + weight_bytes),
        )(x3, *weights)
        return out3.reshape(N, C, H, W)

    # ---- streaming fallback: pass 1 (pool + MLP epilogue) + pass 2 (scale) ----
    block_target = min(8 << 20, budget // 8)             # keep blocks in 2-8 MiB
    if hw_tile_override is not None:
        hw_tile = int(hw_tile_override)
    else:
        hw_tile = max(128, (block_target // (C * itemsize)) // 128 * 128)
    if hw_tile >= HW:
        hw_tile = HW                                      # full-dim block (legal)
    n_tiles = pl.cdiv(HW, hw_tile)
    block_bytes = C * hw_tile * itemsize
    vmem_limit = int(min(budget,
                         max(32 << 20,
                             6 * block_bytes + 2 * weight_bytes + (4 << 20))))

    kern = functools.partial(_pool_mlp_kernel, hw_total=HW, hw_tile=hw_tile)
    scale = pl.pallas_call(
        kern,
        out_shape=jax.ShapeDtypeStruct((N, C, 1), dtype),
        grid=(N, n_tiles),
        in_specs=[pl.BlockSpec((1, C, hw_tile), lambda n, t: (n, 0, t))]
                 + _weight_specs(w_shapes, arity=2),
        out_specs=pl.BlockSpec((1, C, 1), lambda n, t: (n, 0, 0)),
        scratch_shapes=[pltpu.VMEM((C, 1), jnp.float32)],
        compiler_params=pltpu.CompilerParams(
            dimension_semantics=("parallel", "arbitrary"),
            vmem_limit_bytes=vmem_limit),
        cost_estimate=pl.CostEstimate(
            flops=N * C * HW + mlp_flops,
            transcendentals=sigmoids,
            bytes_accessed=N * C * HW * itemsize + weight_bytes
                           + N * C * itemsize),
    )(x3, *weights)

    out3 = pl.pallas_call(
        _scale_kernel,
        out_shape=jax.ShapeDtypeStruct((N, C, HW), dtype),
        grid=(N, n_tiles),
        in_specs=[pl.BlockSpec((1, C, hw_tile), lambda n, t: (n, 0, t)),
                  pl.BlockSpec((1, C, 1), lambda n, t: (n, 0, 0))],
        out_specs=pl.BlockSpec((1, C, hw_tile), lambda n, t: (n, 0, t)),
        input_output_aliases=alias,
        compiler_params=pltpu.CompilerParams(
            dimension_semantics=("parallel", "parallel"),
            vmem_limit_bytes=vmem_limit),
        cost_estimate=pl.CostEstimate(
            flops=N * C * HW, transcendentals=0,
            bytes_accessed=2 * N * C * HW * itemsize + N * C * itemsize),
    )(x3, scale)

    return out3.reshape(N, C, H, W)


# ----------------------------------------------------------------------------
# Parameters & reference
# ----------------------------------------------------------------------------

def init_params(key, C):
    """Deterministic synthetic parameters matching the module's shapes (f32)."""
    C2 = 2 * C
    k1, k2, k3, k4 = jax.random.split(key, 4)
    eps = 1e-5

    # Conv2d(C, 2C, 1): weight (2C, C, 1, 1) -> (2C, C), bias (2C,)
    w1 = jax.random.normal(k1, (C2, C), jnp.float32) * 0.2
    b1 = jax.random.normal(k2, (C2,), jnp.float32) * 0.1
    # BatchNorm2d(2C) eval-mode (PyTorch defaults) -> folded affine
    gamma = jnp.ones((C2,), jnp.float32)
    beta = jnp.zeros((C2,), jnp.float32)
    run_mean = jnp.zeros((C2,), jnp.float32)
    run_var = jnp.ones((C2,), jnp.float32)
    g = gamma / jnp.sqrt(run_var + eps)
    s = beta - run_mean * g
    # Conv2d(2C, C, 1): weight (C, 2C, 1, 1) -> (C, 2C), bias (C,)
    w2 = jax.random.normal(k3, (C, C2), jnp.float32) * 0.2
    b2 = jax.random.normal(k4, (C,), jnp.float32) * 0.1

    return (w1.T,                    # w1t (C, 2C)
            b1.reshape(1, C2),
            g.reshape(1, C2),
            s.reshape(1, C2),
            w2,                      # (C, 2C)
            b2.reshape(C, 1))


def chanel_att_ref(x_nchw, params):
    """Pure-JAX reference (same eval-mode semantics) for validation."""
    w1t, b1, g, s, w2, b2 = params
    N, C, H, W = x_nchw.shape
    pooled = jnp.max(x_nchw.reshape(N, C, H * W), axis=-1).astype(jnp.float32)
    h = pooled @ w1t + b1
    h = jnp.maximum(h * g + s, 0.0)
    att = jax.nn.sigmoid(h @ w2.T + b2[:, 0])                        # (N, C)
    att = att.astype(x_nchw.dtype)[:, :, None, None]
    return att * x_nchw + x_nchw


if __name__ == "__main__":
    key = jax.random.PRNGKey(0)
    kx, kp, kx2 = jax.random.split(key, 3)

    N, C, H, W = 2, 4, 16, 16
    params = init_params(kp, C)

    # --- test 1: fused single-pass path (small slice fits VMEM) ---
    x = jax.random.normal(kx, (N, C, H, W), jnp.float32)
    out = jax.block_until_ready(chanel_att_pallas(x, params))
    ref = chanel_att_ref(x, params)
    assert out.shape == (N, C, H, W)
    assert jnp.allclose(out, ref, atol=1e-5, rtol=1e-5), \
        f"fused path max err {jnp.max(jnp.abs(out - ref))}"

    # --- test 2: force the streaming fallback (multi-tile + ragged last HW
    #     tile: HW=144 with hw_tile=128) to validate the large-shape path ---
    H2 = W2 = 12
    x2 = jax.random.normal(kx2, (N, C, H2, W2), jnp.float32)
    out2 = jax.block_until_ready(
        chanel_att_pallas(x2, params, force_streaming=True, hw_tile_override=128))
    ref2 = chanel_att_ref(x2, params)
    assert out2.shape == (N, C, H2, W2)
    assert jnp.allclose(out2, ref2, atol=1e-5, rtol=1e-5), \
        f"streaming path max err {jnp.max(jnp.abs(out2 - ref2))}"

    print("KERNEL_OK")
</pallas_src>

<mosaic_0001>
module attributes {stable_mosaic.version = 11 : i64} {
  func.func @_fused_kernel(%arg0: i32, %arg1: memref<1x4x256xf32, #tpu.memory_space<vmem>>, %arg2: memref<4x8xf32, #tpu.memory_space<vmem>>, %arg3: memref<1x8xf32, #tpu.memory_space<vmem>>, %arg4: memref<1x8xf32, #tpu.memory_space<vmem>>, %arg5: memref<1x8xf32, #tpu.memory_space<vmem>>, %arg6: memref<4x8xf32, #tpu.memory_space<vmem>>, %arg7: memref<4x1xf32, #tpu.memory_space<vmem>>, %arg8: memref<1x4x256xf32, #tpu.memory_space<vmem>>) attributes {dimension_semantics = [#tpu.dimension_semantics<parallel>], iteration_bounds = array<i64: 2>, scalar_prefetch = 0 : i64, scratch_operands = 0 : i64, tpu.core_type = #tpu.core_type<tc>, window_params = [{transform_indices = @transform_0, window_bounds = array<i64: 1, 4, 256>}, {pipeline_mode = #tpu.pipeline_mode<synchronous>, transform_indices = @transform_1, window_bounds = array<i64: 4, 8>}, {pipeline_mode = #tpu.pipeline_mode<synchronous>, transform_indices = @transform_2, window_bounds = array<i64: 1, 8>}, {pipeline_mode = #tpu.pipeline_mode<synchronous>, transform_indices = @transform_3, window_bounds = array<i64: 1, 8>}, {pipeline_mode = #tpu.pipeline_mode<synchronous>, transform_indices = @transform_4, window_bounds = array<i64: 1, 8>}, {pipeline_mode = #tpu.pipeline_mode<synchronous>, transform_indices = @transform_5, window_bounds = array<i64: 4, 8>}, {pipeline_mode = #tpu.pipeline_mode<synchronous>, transform_indices = @transform_6, window_bounds = array<i64: 4, 1>}, {transform_indices = @transform_7, window_bounds = array<i64: 1, 4, 256>}]} {
    %c0 = arith.constant 0 : index
    %c0_0 = arith.constant 0 : index
    %c0_1 = arith.constant 0 : index
    %0 = vector.load %arg1[%c0, %c0_0, %c0_1] : memref<1x4x256xf32, #tpu.memory_space<vmem>>, vector<1x4x256xf32>
    %1 = vector.shape_cast %0 : vector<1x4x256xf32> to vector<4x256xf32>
    %cst = arith.constant dense<0xFF800000> : vector<4xf32>
    %2 = vector.multi_reduction <maximumf>, %1, %cst [1] : vector<4x256xf32> to vector<4xf32>
    %3 = vector.shape_cast %2 : vector<4xf32> to vector<4x1xf32>
    %c0_2 = arith.constant 0 : index
    %c0_3 = arith.constant 0 : index
    %4 = vector.load %arg2[%c0_2, %c0_3] : memref<4x8xf32, #tpu.memory_space<vmem>>, vector<4x8xf32>
    %c0_4 = arith.constant 0 : index
    %c0_5 = arith.constant 0 : index
    %5 = vector.load %arg3[%c0_4, %c0_5] : memref<1x8xf32, #tpu.memory_space<vmem>>, vector<1x8xf32>
    %c0_6 = arith.constant 0 : index
    %c0_7 = arith.constant 0 : index
    %6 = vector.load %arg4[%c0_6, %c0_7] : memref<1x8xf32, #tpu.memory_space<vmem>>, vector<1x8xf32>
    %c0_8 = arith.constant 0 : index
    %c0_9 = arith.constant 0 : index
    %7 = vector.load %arg5[%c0_8, %c0_9] : memref<1x8xf32, #tpu.memory_space<vmem>>, vector<1x8xf32>
    %c0_10 = arith.constant 0 : index
    %c0_11 = arith.constant 0 : index
    %8 = vector.load %arg6[%c0_10, %c0_11] : memref<4x8xf32, #tpu.memory_space<vmem>>, vector<4x8xf32>
    %c0_12 = arith.constant 0 : index
    %c0_13 = arith.constant 0 : index
    %9 = vector.load %arg7[%c0_12, %c0_13] : memref<4x1xf32, #tpu.memory_space<vmem>>, vector<4x1xf32>
    %10 = vector.broadcast %3 : vector<4x1xf32> to vector<4x8xf32>
    %11 = arith.mulf %4, %10 : vector<4x8xf32>
    %cst_14 = arith.constant dense<0.000000e+00> : vector<8xf32>
    %12 = vector.multi_reduction <add>, %11, %cst_14 [0] : vector<4x8xf32> to vector<8xf32>
    %13 = vector.shape_cast %12 : vector<8xf32> to vector<1x8xf32>
    %14 = arith.addf %13, %5 : vector<1x8xf32>
    %15 = arith.mulf %14, %6 : vector<1x8xf32>
    %16 = arith.addf %15, %7 : vector<1x8xf32>
    %cst_15 = arith.constant 0.000000e+00 : f32
    %17 = vector.broadcast %cst_15 : f32 to vector<1x8xf32>
    %18 = arith.maximumf %16, %17 : vector<1x8xf32>
    %19 = vector.broadcast %18 : vector<1x8xf32> to vector<4x8xf32>
    %20 = arith.mulf %8, %19 : vector<4x8xf32>
    %cst_16 = arith.constant dense<0.000000e+00> : vector<4xf32>
    %21 = vector.multi_reduction <add>, %20, %cst_16 [1] : vector<4x8xf32> to vector<4xf32>
    %22 = vector.shape_cast %21 : vector<4xf32> to vector<4x1xf32>
    %23 = arith.addf %22, %9 : vector<4x1xf32>
    %24 = arith.negf %23 : vector<4x1xf32>
    %25 = math.exp %24 : vector<4x1xf32>
    %cst_17 = arith.constant 1.000000e+00 : f32
    %26 = vector.broadcast %cst_17 : f32 to vector<4x1xf32>
    %27 = arith.addf %26, %25 : vector<4x1xf32>
    %28 = arith.divf %26, %27 : vector<4x1xf32>
    %cst_18 = arith.constant 1.000000e+00 : f32
    %29 = vector.broadcast %cst_18 : f32 to vector<4x1xf32>
    %30 = arith.addf %28, %29 : vector<4x1xf32>
    %31 = vector.broadcast %30 : vector<4x1xf32> to vector<4x256xf32>
    %32 = arith.mulf %1, %31 : vector<4x256xf32>
    %c0_19 = arith.constant 0 : index
    %c0_20 = arith.constant 0 : index
    %c0_21 = arith.constant 0 : index
    %33 = vector.load %arg8[%c0_19, %c0_20, %c0_21] : memref<1x4x256xf32, #tpu.memory_space<vmem>>, vector<1x4x256xf32>
    %34 = vector.shape_cast %33 : vector<1x4x256xf32> to vector<4x256xf32>
    %35 = vector.shape_cast %32 : vector<4x256xf32> to vector<1x4x256xf32>
    tpu.vector_store %arg8[%c0_19, %c0_20, %c0_21], %35 {strides = array<i32>} : memref<1x4x256xf32, #tpu.memory_space<vmem>>, vector<1x4x256xf32>,
    return
  }
  func.func @transform_0(%arg0: i32) -> (i32, i32, i32) {
    %c0_i32 = arith.constant 0 : i32
    %c0_i32_0 = arith.constant 0 : i32
    %c0_i32_1 = arith.constant 0 : i32
    return %arg0, %c0_i32, %c0_i32_0 : i32, i32, i32
  }
  func.func @transform_1(%arg0: i32) -> (i32, i32) {
    %c0_i32 = arith.constant 0 : i32
    %c0_i32_0 = arith.constant 0 : i32
    %c0_i32_1 = arith.constant 0 : i32
    return %c0_i32, %c0_i32_0 : i32, i32
  }
  func.func @transform_2(%arg0: i32) -> (i32, i32) {
    %c0_i32 = arith.constant 0 : i32
    %c0_i32_0 = arith.constant 0 : i32
    %c0_i32_1 = arith.constant 0 : i32
    return %c0_i32, %c0_i32_0 : i32, i32
  }
  func.func @transform_3(%arg0: i32) -> (i32, i32) {
    %c0_i32 = arith.constant 0 : i32
    %c0_i32_0 = arith.constant 0 : i32
    %c0_i32_1 = arith.constant 0 : i32
    return %c0_i32, %c0_i32_0 : i32, i32
  }
  func.func @transform_4(%arg0: i32) -> (i32, i32) {
    %c0_i32 = arith.constant 0 : i32
    %c0_i32_0 = arith.constant 0 : i32
    %c0_i32_1 = arith.constant 0 : i32
    return %c0_i32, %c0_i32_0 : i32, i32
  }
  func.func @transform_5(%arg0: i32) -> (i32, i32) {
    %c0_i32 = arith.constant 0 : i32
    %c0_i32_0 = arith.constant 0 : i32
    %c0_i32_1 = arith.constant 0 : i32
    return %c0_i32, %c0_i32_0 : i32, i32
  }
  func.func @transform_6(%arg0: i32) -> (i32, i32) {
    %c0_i32 = arith.constant 0 : i32
    %c0_i32_0 = arith.constant 0 : i32
    %c0_i32_1 = arith.constant 0 : i32
    return %c0_i32, %c0_i32_0 : i32, i32
  }
  func.func @transform_7(%arg0: i32) -> (i32, i32, i32) {
    %c0_i32 = arith.constant 0 : i32
    %c0_i32_0 = arith.constant 0 : i32
    %c0_i32_1 = arith.constant 0 : i32
    return %arg0, %c0_i32, %c0_i32_0 : i32, i32, i32
  }
}

</mosaic_0001>

<bundles_post_ra>
// kernel: tpu_custom_call.1
= control target key start
LH: loop header
LB: loop body
LE: loop exit
PB: predicated region body
PF: predicated region fallthrough
CT: control target
= control target key end

     0   :  { %s1042_s0 = inlined_call_operand.hbm [shape: f32[2,4,256], index: 0, kind: input, shape index: {}]   ;;  %s1043_s1 = inlined_call_operand.vmem [shape: f32[4,8], index: 1, kind: input, shape index: {}]   ;;  %s1044_s2 = inlined_call_operand.hbm [shape: f32[1,8], index: 2, kind: input, shape index: {}]   ;;  %s1045_s3 = inlined_call_operand.hbm [shape: f32[1,8], index: 3, kind: input, shape index: {}]   ;;  %s1046_s4 = inlined_call_operand.hbm [shape: f32[1,8], index: 4, kind: input, shape index: {}]   ;;  %s1047_s5 = inlined_call_operand.vmem [shape: f32[4,8], index: 5, kind: input, shape index: {}]   ;;  %s1048_s6 = inlined_call_operand.vmem [shape: f32[4,1], index: 6, kind: input, shape index: {}]   ;;  %s1049_s7 = inlined_call_operand.hbm [shape: f32[2,4,256], index: 7, kind: output, shape index: {}]  }
   0x1   :  { %1050 = sst [smem:[#allocation15_spill]] %s1044_s2 }
   0x2   :  { %12 = vsyncpa [#allocation3], 0 }
   0x3   :  { %14 = vsyncpa [#allocation3 + $0x1], 0 }
   0x4   :  { %15 = vsyncpa [#allocation6], 0 }
   0x5   :  { %16 = vsyncpa [#allocation9], 0 }
   0x6   :  { %17 = vsyncpa [#allocation4], 0 }
   0x7   :  { %19 = vsyncpa [#allocation4 + $0x1], 0  ;;  %s875_s24 = smov 0   ;;  %s877_s25 = smov 0  }
   0x8   :  { %s879_s26 = smov 0   ;;  %s881_s27 = smov 0  }
   0x9 LB: > { %s896_s28 = sadd.s32 4294967295, %s828_s27   ;;  %s526_s29 = sadd.s32 4294967294, %s828_s27   ;;  %s828_s27 = sphi %s881_s27, %s1061_s27   ;;  %s824_s26 = sphi %s879_s26, %s1060_s26   ;;  %s820_s25 = sphi %s877_s25, %s1059_s25   ;;  %s816_s24 = sphi %s875_s24, %s1058_s24  }
   0xa   : > { %p45_p0 = scmp.ne.s32.totalorder %s820_s25, %s816_s24  ;;  %p46_p1 = scmp.eq.s32.totalorder %s896_s28, 0 }
   0xb   : > { %p195_p2 = scmp.eq.s32.totalorder %s896_s28, 1  ;;  %p201_p3 = scmp.eq.s32.totalorder %s526_s29, 1 }
   0xc   : > { %p905_p4 = por %p46_p1, %p45_p0  ;;  %p527_p5 = scmp.ge.s32.totalorder %s828_s27, 1 }
   0xd   : > { %p910_p6 = por %p201_p3, %p45_p0  ;;  %p208_p7 = scmp.lt.s32.totalorder %s828_s27, 3 }
   0xe   : > { %s1053_s2 = sld [smem:[#allocation15_spill]]  ;;  %s830_s13 = smov [#allocation5]  }
   0xf   : > { %p918_p8 = pnand %p527_p5, %p208_p7  ;;  %s225_s14 = sshll.u32 %s830_s13, 4  ;;  %s226_s14 = int_to_ptr.vmem [resolvable:$true] %s225_s14 }
  0x10   : > { %s235_s17 = sshll.u32 %s1045_s3, 4  ;;  %s247_s20 = sshll.u32 %s1046_s4, 4  ;;  %s236_s17 = int_to_ptr.hbm [resolvable:$true] %s235_s17  ;;  %s248_s20 = int_to_ptr.hbm [resolvable:$true] %s247_s20 }
  0x11   : > { %p565_p10 = pneg %p918_p8  ;;  %s831_s21 = smov [#allocation7]  }
  0x12   : > { %s237_s22 = sshll.u32 %s831_s21, 4  ;;  %s832_s23 = smov [#allocation8]   ;;  %s238_s22 = int_to_ptr.vmem [resolvable:$true] %s237_s22 }
  0x13   : > { %p566_p11 = pnand %p565_p10, %p46_p1  ;;  %s249_s29 = sshll.u32 %s832_s23, 4  ;;  %s250_s29 = int_to_ptr.vmem [resolvable:$true] %s249_s29 }
  0x14   : > { %s223_s11 = sshll.u32 %s1053_s2, 4  ;;  %s934_s9 = sadd.s32 1, %s828_s27   ;;  %s224_s11 = int_to_ptr.hbm [resolvable:$true] %s223_s11 }
  0x15   : > { %568 = dma.hbm_to_vmem [thread:$0]  (!%p566_p11), %s224_s11, 16, %s226_s14, [#allocation6]  }
  0x16   : > { %571 = dma.hbm_to_vmem [thread:$0]  (!%p566_p11), %s236_s17, 16, %s238_s22, [#allocation6]  }
  0x17   : > { %574 = dma.hbm_to_vmem [thread:$0]  (!%p566_p11), %s248_s20, 16, %s250_s29, [#allocation9]  }
  0x18   : > { %s29_s10 = ssub.s32 %s828_s27, %s934_s9  ;;  %s32_s13 = sadd.s32 1, %s824_s26 }
  0x19   : > { %p30_p12 = scmp.eq.s32.totalorder %s29_s10, 0  ;;  %p39_p13 = scmp.ne.s32.totalorder %s824_s26, %s820_s25 }
  0x1a   : > { %p40_p0 = scmp.eq.s32.totalorder %s828_s27, 0  ;;  %p586_p5 = scmp.lt.s32.totalorder %s828_s27, 2 }
  0x1b   : > { %s943_s15 = scalar_select %p30_p12, %s824_s26, %s32_s13  }
  0x1c   : > { %p947_p3 = por %p195_p2, %p39_p13  ;;  %s266_s14 = sand.u32 1, %s824_s26  }
  0x1d   : > { %s547_s16 = sshll.u32 %s828_s27, 3  ;;  %p41_p7 = por %p40_p0, %p39_p13 }
  0x1e   : > { %s532_s17 = sshll.u32 %s266_s14, 3  ;;  %s275_s20 = scalar_lea.hbm %s1042_s0, %s547_s16 }
  0x1f   : > { %s277_s21 = sshll.u32 %s275_s20, 4  ;;  %s270_s22 = scalar_lea.vmem [#allocation2], %s532_s17  ;;  %s278_s21 = int_to_ptr.hbm [resolvable:$true] %s277_s21 }
  0x20   : > { %s279_s23 = sshll.u32 %s270_s22, 4  ;;  %p957_p10 = pnand %p586_p5, %p41_p7  ;;  %s280_s23 = int_to_ptr.vmem [resolvable:$true] %s279_s23 }
  0x21   : > { %s267_s10 = scalar_lea.sflag [#allocation3], %s266_s14  ;;  %s724_s13 = sshra.s32 %s278_s21, 4  ;;  %s725_s13 = int_to_ptr.hbm [resolvable:$true] %s724_s13 }
  0x22   : > { %s726_s2 = scalar_lea.hbm %s725_s13, 8  ;;  %p728_p11 = pneg %p957_p10 }
  0x23   : > { %p727_p2 = scmp.ne.s32.totalorder %s725_s13, %s726_s2  ;;  %s731_s17 = scalar_lea.hbm %s1042_s0, 16 }
  0x24   : > { %p732_p0 = scmp.lt.s32.totalorder %s725_s13, %s1042_s0  ;;  %p733_p5 = scmp.lt.s32.totalorder %s731_s17, %s726_s2 }
  0x25   : > { %p729_p12 = pnand %p728_p11, %p727_p2 }
  0x26   : > { %p734_p7 = por %p733_p5, %p732_p0 }
  0x27   : > { %p730_p13 = pneg %p729_p12 }
  0x29   : > { %p735_p9 = pnand %p734_p7, %p730_p13 }
  0x2b   : > { %738 = shalt.err (!%p735_p9)
}
  0x2c   : > { %578 = dma.hbm_to_vmem [thread:$0]  (!%p957_p10), %s278_s21, 128, %s280_s23, %s267_s10  }
  0x2d   : > { %288 = sbr.rel (%p918_p8) target bundleno = 481 (0x1e1), region = 48  ;;  %s974_s14 = sand.u32 (!%p918_p8), 1, %s820_s25  }
  0x2e   : > { %s536_s22 = sshll.u32 (!%p918_p8), %s974_s14, 3  ;;  %s291_s16 = scalar_lea.sflag (!%p918_p8), [#allocation3], %s974_s14 }
  0x2f   : > { %s294_s2 = scalar_lea.vmem (!%p918_p8), [#allocation2], %s536_s22 }
  0x32   : > { %799 = dma.done.wait (%p905_p4), %s291_s16, 128  }
  0x33   : > { %801 = vsyncadd (%p905_p4), %s291_s16, 4294967168 }
  0x34   : > { %803 = dma.done.wait (%p46_p1), [#allocation6], 32  }
  0x35   : > { %805 = vsyncadd (%p46_p1), [#allocation6], 4294967264 }
  0x36   : > { %807 = dma.done.wait (%p46_p1), [#allocation9], 16  }
  0x37   : > { %809 = vsyncadd (%p46_p1), [#allocation9], 4294967280  ;;  %v992_v0 = vld [vmem:[%s294_s2] sm:$0xff]  ;;  %vm348_vm0 = vcmask 1043456   ;;  %v354_v6 = vld [vmem:[%s1043_s1] sm:$0xf] }
  0x38   : > { %343 = vst [vmem:[#allocation1] ss:$2 sm:$0xff] %v992_v0  ;;  %vm361_vm1 = vcmask 60416   ;;  %v355_v15 = vld [vmem:[#allocation5] sm:$0x1]  ;;  %v833_v27 = vmov 0  }
  0x39   : > { %v356_v17 = vld [vmem:[#allocation7] sm:$0x1]  ;;  %v357_v19 = vld [vmem:[#allocation8] sm:$0x1]  ;;  %v358_v23 = vld [vmem:[%s1047_s5] sm:$0xf]  ;;  %628 = vset.pattern.permute.xlu1 %v833_v27  ;;  %629 = vset.pattern.permute.xlu0 %v833_v27 }
  0x3a   : > { %v359_v28 = vld [vmem:[%s1048_s6] sm:$0xf]  ;;  %v834_v45 = vmov 839922192   ;;  %s548_s13 = sshll.u32 %s896_s28, 3  ;;  %s340_s20 = scalar_lea.vmem [#allocation10], %s536_s22 }
  0x3b   : > { %v404_v46 = vunpack.c.l.s4 %v834_v45  ;;  %s422_s19 = scalar_lea.hbm %s1049_s7, %s548_s13  ;;  %s424_s16 = sshll.u32 %s340_s20, 4  ;;  %s425_s16 = int_to_ptr.vmem [resolvable:$true] %s424_s16 }
  0x3c   : > { %s426_s2 = sshll.u32 %s422_s19, 4  ;;  %s411_s30 = scalar_lea.sflag [#allocation4], %s974_s14  ;;  %s427_s2 = int_to_ptr.hbm [resolvable:$true] %s426_s2 }
  0x3d   : > { %v405_v47 = vunpack.c.0.s8 %v404_v46  ;;  %s768_s12 = sshra.s32 %s427_s2, 4  ;;  %s774_s22 = scalar_lea.hbm %s1049_s7, 16  ;;  %s769_s12 = int_to_ptr.hbm [resolvable:$true] %s768_s12 }
  0x3e   : > { %s770_s28 = scalar_lea.hbm %s769_s12, 8  ;;  %p775_p9 = scmp.lt.s32.totalorder %s769_s12, %s1049_s7 }
  0x3f   : > { %v344_v1 = vld.sshfl [vmem:[#allocation1] sm:$0xff pattern:$0x75316420]  ;;  %v345_v2 = vld.sshfl [vmem:[#allocation1 + $0x8] sm:$0xff pattern:$0x75316420]  ;;  %p771_p1 = scmp.ne.s32.totalorder %s769_s12, %s770_s28  ;;  %p776_p10 = scmp.lt.s32.totalorder %s774_s22, %s770_s28 }
  0x40   : > { %v349_v3 = vsel %vm348_vm0, %v344_v1, -inf  ;;  %v350_v4 = vsel %vm348_vm0, %v345_v2, -inf }
  0x41   : > { %v351_v5 = vmax.f32 %v349_v3, %v350_v4  ;;  %p772_p4 = pnand %p771_p1, %p947_p3  ;;  %p777_p2 = por %p776_p10, %p775_p9 }
  0x43   : > { %352 = vmax.xlane.f32.xlu0 %v351_v5  ;;  %p773_p8 = pneg %p772_p4 }
  0x45   : > { %p778_p11 = pnand %p777_p2, %p773_p8 }
  0xb6   : > { %v353_v7 = vpop.xlane.xlu0 %352 }
  0xb7   : > { %v360_v8 = vmul.f32 %v354_v6, %v353_v7 }
  0xb9   : > { %v362_v9 = vsel %vm361_vm1, %v360_v8, 0.0 }
  0xba   : > { %v363_v10 = vrot.slane %v362_v9, 4 }
  0xbc   : > { %v364_v11 = vadd.f32 %v363_v10, %v362_v9 }
  0xbe   : > { %v365_v12 = vrot.slane %v364_v11, 2 }
  0xc0   : > { %v366_v13 = vadd.f32 %v365_v12, %v364_v11 }
  0xc2   : > { %v367_v14 = vrot.slane %v366_v13, 1 }
  0xc4   : > { %v368_v16 = vadd.f32 %v367_v14, %v366_v13 }
  0xc6   : > { %v369_v18 = vadd.f32 %v368_v16, %v355_v15 }
  0xc8   : > { %v370_v20 = vmul.f32 %v369_v18, %v356_v17 }
  0xca   : > { %v371_v21 = vadd.f32 %v370_v20, %v357_v19 }
  0xcc   : > { %v372_v22 = vmax.f32 %v371_v21, 0.0 }
  0xce   : > { %v373_v24 = vperm.slane %v372_v22, 0 }
  0xd0   : > { %v374_v25 = vmul.f32 %v373_v24, %v358_v23 }
  0xd2   : > { %v375_v26 = vsel %vm361_vm1, %v374_v25, 0.0 }
  0xd3   : > { %376 = vadd.xlane.f32.xlu0 %v375_v26 }
 0x146   : > { %v377_v29 = vpop.xlane.xlu0 %376 }
 0x147   : > { %v378_v30 = vadd.f32 %v377_v29, %v359_v28 }
 0x149   : > { %v541_v31 = vmul.f32 -1.442695, %v378_v30 }
 0x14b   : > { %630 = vpow2.f32 %v541_v31 }
 0x151   : > { %v631_v32 = vpop.eup %630 }
 0x152   : > { %v382_v33 = vadd.f32 1.0, %v631_v32 }
 0x154   : > { %632 = vrcp.f32 %v382_v33  ;;  %v394_v37 = vand.u32 2147483648, %v382_v33  ;;  %v392_v39 = vand.u32 2147483647, %v382_v33  ;;  %vm388_vm3 = vweird.f32 %v382_v33 }
 0x156   : > { %v395_v41 = vor.u32 1.1754944e-38, %v394_v37  ;;  %vm393_vm5 = vcmp.eq.f32.partialorder %v392_v39, 8.507059e+37 }
 0x15a   : > { %v633_v34 = vpop.eup %632 }
 0x15b   : > { %v384_v35 = vmul.f32 %v633_v34, %v382_v33  ;;  %vm389_vm2 = vweird.f32 %v633_v34 }
 0x15c   : > { %vm390_vm4 = vmor %vm388_vm3, %vm389_vm2 }
 0x15d   : > { %v385_v36 = vsub.f32 1.0, %v384_v35 }
 0x15f   : > { %v386_v38 = vmul.f32 %v633_v34, %v385_v36 }
 0x161   : > { %v387_v40 = vadd.f32 %v633_v34, %v386_v38 }
 0x163   : > { %v391_v42 = vsel %vm390_vm4, %v633_v34, %v387_v40 }
 0x164   : > { %v396_v43 = vsel %vm393_vm5, %v395_v41, %v391_v42 }
 0x165   : > { %v398_v44 = vadd.f32 1.0, %v396_v43 }
 0x167   : > { %401 = vperm.xlu1 %628, %v398_v44  }
 0x1d9   : > { %v402_v48 = vpop.permute.xlu1 %401 }
 0x1da   : > { %v406_v49 = vperm.slane %v402_v48, %v405_v47 }
 0x1dc   : > { %v408_v50 = vmul.f32 %v406_v49, %v992_v0 }
 0x1de   : > { %409 = vst [vmem:[%s340_s20] sm:$0xff] %v408_v50 }
 0x1df   : > { %781 = shalt.err (!%p778_p11)
}
 0x1e0   : > { %563 = dma.vmem_to_hbm [thread:$0]  (%p947_p3), %s425_s16, 128, %s427_s2, %s411_s30  }
 0x1e1 PF: > { %s438_s14 = sand.u32 1, %s816_s24   ;;  %p1057_p12 = scmp.ge.s32.totalorder %s828_s27, 2 }
 0x1e2   : > { %s439_s13 = scalar_lea.sflag [#allocation4], %s438_s14 }
 0x1e3   : > { %p580_p13 = pnand %p1057_p12, %p910_p6 }
 0x1e5   : > { %p581_p0 = pneg %p580_p13 }
 0x1e7   : > { %811 = dma.done.wait (%p581_p0), %s439_s13, 128  }
 0x1e8   : > { %813 = vsyncadd (%p581_p0), %s439_s13, 4294967168  ;;  %p22_p5 = scmp.ge.s32.totalorder %s934_s9, 4   ;;  %s1058_s24 = smov %s820_s25 }
 0x1e9   : > { %s1059_s25 = smov %s824_s26  ;;  %s1060_s26 = smov %s943_s15 }
 0x1ea   : > { %s1061_s27 = smov %s934_s9  ;;  %24 = sbr.rel (!%p22_p5) target bundleno = 9 (0x9), region = 105 }
 0x1ef   :  { %445 = vsyncpa [#allocation3], 1 }
 0x1f0   :  { %447 = vsyncpa [#allocation3 + $0x1], 1 }
 0x1f1   :  { %448 = vsyncpa [#allocation6], 1 }
 0x1f2   :  { %449 = vsyncpa [#allocation9], 1 }
 0x1f3   :  { %450 = vsyncpa [#allocation4], 1 }
 0x1f4   :  { %452 = vsyncpa [#allocation4 + $0x1], 1 }

</bundles_post_ra>
